<compile_context>
chip_gen: v6e
topology: v6e:2x2x1
jax: 0.10.0
libtpu: 0.0.40
codegen_flags: <defaults>
</compile_context>

<pallas_src>
import jax
import jax.numpy as jnp
from jax.experimental import pallas as pl
from jax.experimental.pallas import tpu as pltpu

EPS = 1e-6


# ----------------------------------------------------------------------------- utilities
def _round_up(n, m):
    return ((n + m - 1) // m) * m


def _vmem_capacity_bytes():
    """Physical VMEM of the local TPU generation; v7x-safe fallback if unknown."""
    try:
        return int(pltpu.get_tpu_info().vmem_capacity_bytes)
    except Exception:
        return 64 * 1024 * 1024          # assume v7x (smallest VMEM) if the query fails


def _vmem_bytes(tm, tk, D, xsz, osz, streaming):
    """Rough VMEM footprint of one pipelined step (double-buffered BlockSpec inputs)."""
    xf  = 2 * tm * D * xsz               # full-row x tile
    out = 2 * tm * D * osz               # output tile
    tmp = 2 * tm * D * 4                 # in-kernel f32/bf16 temporaries (rough)
    if streaming:
        xk    = 2 * tm * tk * xsz        # K-chunk of x (matmul LHS)
        w     = 2 * tk * D * 2           # streamed bf16 weight slab
        acc   = tm * D * 4               # f32 accumulator scratch
        stats = 2 * tm * 128 * 4         # mean / rstd scratch ((tm,1) padded to 128 lanes)
    else:
        xk, acc, stats = 0, 0, 0
        w = 2 * D * D * 2                # resident bf16 weight
    return xf + out + tmp + xk + w + acc + stats + (2 << 20)   # +2 MiB slack


_TM_CANDIDATES = (2048, 1024, 512, 256, 128, 64, 32, 16, 8)


def _best_tm(m_cap, tk, D, xsz, osz, streaming, budget):
    for cand in _TM_CANDIDATES:
        tm = min(cand, m_cap)
        if _vmem_bytes(tm, tk, D, xsz, osz, streaming) <= budget:
            return tm
    return None


def _choose_tiles(M, D, xsz, osz, budget, k_tile=None):
    """Pick (tm, tk, streaming).  Resident W for small/medium D, K-streaming for large D."""
    m_cap = max(8, _round_up(min(M, 2048), 8))

    # explicit override (used to exercise / force the streaming path)
    if k_tile is not None and k_tile < D and D % k_tile == 0 and k_tile % 128 == 0:
        tm = _best_tm(m_cap, k_tile, D, xsz, osz, True, budget) or 8
        return tm, k_tile, True

    # prefer resident W only if it does not force the row tile below 256
    tm_res = _best_tm(m_cap, D, D, xsz, osz, False, budget)
    if tm_res is not None and (tm_res >= 256 or tm_res >= m_cap):
        return tm_res, D, False

    tk = next((c for c in (512, 256, 128) if c < D and D % c == 0), None)
    if tk is not None:
        tm_str = _best_tm(m_cap, tk, D, xsz, osz, True, budget)
        if tm_str is not None and (tm_res is None or tm_str > tm_res):
            return tm_str, tk, True

    return (tm_res if tm_res is not None else 8), D, False


# ----------------------------------------------------------------------------- kernels
def _fused_kernel_resident(x_ref, w_ref, b_ref, o_ref):
    """One (tm, D) row tile: out = x + (LayerNorm_core(x) @ W_folded + b_folded)."""
    x = x_ref[...].astype(jnp.float32)
    d = x.shape[-1]
    mean = jnp.mean(x, axis=-1, keepdims=True)
    c = x - mean
    var = jnp.sum(c * c, axis=-1, keepdims=True) / (d - 1)          # unbiased (torch default)
    rstd = pl.reciprocal(jnp.sqrt(var) + EPS, approx=True)           # EUP slot
    normed = (c * rstd).astype(jnp.bfloat16)                         # affine folded into W'/b'
    y = jnp.dot(normed, w_ref[...], preferred_element_type=jnp.float32) + b_ref[...]
    # dropout (eval mode) => identity.
    # TODO(synk): training-mode dropout via pltpu.prng_* (cannot match torch RNG bit-for-bit).
    o_ref[...] = (x + y).astype(o_ref.dtype)


def _fused_kernel_streaming(xf_ref, xk_ref, w_ref, b_ref, o_ref, acc_ref, mean_ref, rstd_ref):
    """Large-D path: W streams in (tk, D) slabs along grid axis k (innermost, 'arbitrary').

    xf_ref : (tm, D)  full-row x, resident per row tile (LN stats + residual)
    xk_ref : (tm, tk) K-chunk of x (matmul LHS)
    w_ref  : (tk, D)  bf16 folded-weight slab
    acc_ref: (tm, D)  f32 accumulator scratch
    """
    k = pl.program_id(1)

    @pl.when(k == 0)
    def _():
        xf = xf_ref[...].astype(jnp.float32)
        d = xf.shape[-1]
        mean = jnp.mean(xf, axis=-1, keepdims=True)
        c = xf - mean
        var = jnp.sum(c * c, axis=-1, keepdims=True) / (d - 1)
        mean_ref[...] = mean
        rstd_ref[...] = pl.reciprocal(jnp.sqrt(var) + EPS, approx=True)
        acc_ref[...] = jnp.zeros_like(acc_ref)

    normed = ((xk_ref[...].astype(jnp.float32) - mean_ref[...]) * rstd_ref[...]).astype(jnp.bfloat16)
    acc_ref[...] += jnp.dot(normed, w_ref[...], preferred_element_type=jnp.float32)

    @pl.when(k == pl.num_programs(1) - 1)
    def _():
        o_ref[...] = (xf_ref[...].astype(jnp.float32) + acc_ref[...] + b_ref[...]
                      ).astype(o_ref.dtype)


# ----------------------------------------------------------------------------- wrapper
def fold_layernorm_into_linear(scale, shift, w, b):
    """Fold the LayerNorm affine into the Linear (do this ONCE per layer, not per call):
         ((c*rstd)*scale + shift) @ W + b = (c*rstd) @ (diag(scale)@W) + (shift@W + b)
    """
    w_folded = (scale[:, None] * w).astype(jnp.bfloat16)                 # (D, D) bf16
    b_folded = (shift @ w + b).astype(jnp.float32).reshape(1, -1)        # (1, D) f32
    return w_folded, b_folded


def sublayer_connection(x, w_folded, b_folded, *, k_tile=None):
    """x: (B, S, D) f32 or bf16.  w_folded: (D, D) bf16.  b_folded: (1, D) f32.

    Best performance when D is a multiple of 128 (lane-dense stores).  Ragged B*S is
    handled by Pallas partial last-block semantics (no padding copy of x).
    """
    B, S, D = x.shape
    M = B * S
    assert w_folded.shape == (D, D) and b_folded.shape == (1, D)

    x2 = x.reshape(M, D)
    xsz = x2.dtype.itemsize
    osz = x.dtype.itemsize

    cap = _vmem_capacity_bytes()
    budget = min(int(0.70 * cap), 96 * 1024 * 1024)          # v5e/v6e ~90 MiB, v7x ~45 MiB
    tm, tk, streaming = _choose_tiles(M, D, xsz, osz, budget, k_tile)
    est = _vmem_bytes(tm, tk, D, xsz, osz, streaming)
    vmem_limit = int(min(max(int(1.3 * est), 32 * 1024 * 1024), int(0.85 * cap)))

    grid_m = pl.cdiv(M, tm)                                   # partial last block, no jnp.pad
    flops = 2 * M * D * D + 6 * M * D
    bytes_accessed = M * D * (xsz + osz) + D * D * 2 + 4 * D
    if streaming:
        bytes_accessed += M * D * xsz                         # x read twice on the streamed path
    cost = pl.CostEstimate(flops=flops, transcendentals=2 * M, bytes_accessed=bytes_accessed)

    if not streaming:
        # Resident-W path (D small enough that the bf16 weight + big row tile fit VMEM).
        out = pl.pallas_call(
            _fused_kernel_resident,
            out_shape=jax.ShapeDtypeStruct((M, D), x.dtype),
            grid_spec=pltpu.PrefetchScalarGridSpec(
                num_scalar_prefetch=0,
                grid=(grid_m,),
                in_specs=[
                    pl.BlockSpec((tm, D), lambda i: (i, 0)),      # x row tile
                    pl.BlockSpec((D, D), lambda i: (0, 0)),       # folded W (bf16, resident)
                    pl.BlockSpec((1, D), lambda i: (0, 0)),       # folded bias
                ],
                out_specs=pl.BlockSpec((tm, D), lambda i: (i, 0)),
            ),
            compiler_params=pltpu.CompilerParams(
                dimension_semantics=("parallel",),                # row axis shards across TCs
                vmem_limit_bytes=vmem_limit,
            ),
            cost_estimate=cost,
        )(x2, w_folded, b_folded)
    else:
        # K-streaming path: W slabs (tk, D) along an inner 'arbitrary' axis, f32 accumulator.
        nk = D // tk
        out = pl.pallas_call(
            _fused_kernel_streaming,
            out_shape=jax.ShapeDtypeStruct((M, D), x.dtype),
            grid_spec=pltpu.PrefetchScalarGridSpec(
                num_scalar_prefetch=0,
                grid=(grid_m, nk),
                in_specs=[
                    pl.BlockSpec((tm, D), lambda i, k: (i, 0)),   # full-row x (stats+residual)
                    pl.BlockSpec((tm, tk), lambda i, k: (i, k)),  # K-chunk of x (matmul LHS)
                    pl.BlockSpec((tk, D), lambda i, k: (k, 0)),   # streamed W slab (bf16)
                    pl.BlockSpec((1, D), lambda i, k: (0, 0)),    # folded bias
                ],
                out_specs=pl.BlockSpec((tm, D), lambda i, k: (i, 0)),
                scratch_shapes=[
                    pltpu.VMEM((tm, D), jnp.float32),             # accumulator
                    pltpu.VMEM((tm, 1), jnp.float32),             # mean
                    pltpu.VMEM((tm, 1), jnp.float32),             # 1 / (std + eps)
                ],
            ),
            compiler_params=pltpu.CompilerParams(
                dimension_semantics=("parallel", "arbitrary"),
                vmem_limit_bytes=vmem_limit,
            ),
            cost_estimate=cost,
        )(x2, x2, w_folded, b_folded)

    return out.reshape(B, S, D)


# ----------------------------------------------------------------------------- reference
def _reference(x, scale, shift, w, b):
    # Pure-JAX reference mirroring the PyTorch module (eval mode), all f32.
    x = x.astype(jnp.float32)
    d = x.shape[-1]
    mean = jnp.mean(x, axis=-1, keepdims=True)
    std = jnp.sqrt(jnp.sum((x - mean) ** 2, axis=-1, keepdims=True) / (d - 1))
    normed = (x - mean) * scale / (std + EPS) + shift
    return x + (normed @ w + b)


if __name__ == "__main__":
    key = jax.random.PRNGKey(0)

    configs = [
        # (B, S, D, activation dtype, forced K tile, tolerance)
        dict(B=2, S=8, D=128, dtype=jnp.float32,  k_tile=None, tol=5e-2),  # resident-W, aligned
        dict(B=2, S=7, D=128, dtype=jnp.float32,  k_tile=None, tol=5e-2),  # ragged rows, no pad
        dict(B=2, S=9, D=256, dtype=jnp.float32,  k_tile=128,  tol=5e-2),  # K-streaming path
        dict(B=2, S=8, D=128, dtype=jnp.bfloat16, k_tile=None, tol=1e-1),  # bf16 activations
    ]

    for idx, cfg in enumerate(configs):
        B, S, D = cfg["B"], cfg["S"], cfg["D"]
        ks, kh, kw, kb, kx = jax.random.split(jax.random.fold_in(key, idx), 5)
        # Deterministic params; non-trivial scale/shift so the affine folding is exercised.
        scale = 1.0 + 0.1 * jax.random.normal(ks, (D,), jnp.float32)   # LayerNorm.scale
        shift = 0.1 * jax.random.normal(kh, (D,), jnp.float32)         # LayerNorm.shift
        w = 0.1 * jax.random.normal(kw, (D, D), jnp.float32)           # sublayer Linear weight
        b = 0.1 * jax.random.normal(kb, (D,), jnp.float32)             # sublayer Linear bias
        x = jax.random.normal(kx, (B, S, D), jnp.float32).astype(cfg["dtype"])

        w_f, b_f = fold_layernorm_into_linear(scale, shift, w, b)      # hoisted: once per layer
        out = jax.block_until_ready(sublayer_connection(x, w_f, b_f, k_tile=cfg["k_tile"]))
        ref = _reference(x, scale, shift, w, b)

        assert out.shape == (B, S, D)
        # bf16 MXU inputs + approx reciprocal => looser tolerance than pure f32.
        assert jnp.allclose(out.astype(jnp.float32), ref,
                            atol=cfg["tol"], rtol=cfg["tol"]), f"mismatch: {cfg}"

    print("KERNEL_OK")
</pallas_src>

<mosaic_0001>
module attributes {stable_mosaic.version = 11 : i64} {
  func.func @_fused_kernel_resident(%arg0: i32, %arg1: memref<16x128xf32, #tpu.memory_space<vmem>>, %arg2: memref<128x128xbf16, #tpu.memory_space<vmem>>, %arg3: memref<1x128xf32, #tpu.memory_space<vmem>>, %arg4: memref<16x128xf32, #tpu.memory_space<vmem>>) attributes {dimension_semantics = [#tpu.dimension_semantics<parallel>], iteration_bounds = array<i64: 1>, scalar_prefetch = 0 : i64, scratch_operands = 0 : i64, tpu.core_type = #tpu.core_type<tc>, window_params = [{transform_indices = @transform_0, window_bounds = array<i64: 16, 128>}, {pipeline_mode = #tpu.pipeline_mode<synchronous>, transform_indices = @transform_1, window_bounds = array<i64: 128, 128>}, {pipeline_mode = #tpu.pipeline_mode<synchronous>, transform_indices = @transform_2, window_bounds = array<i64: 1, 128>}, {transform_indices = @transform_3, window_bounds = array<i64: 16, 128>}]} {
    %c0 = arith.constant 0 : index
    %c0_0 = arith.constant 0 : index
    %0 = vector.load %arg1[%c0, %c0_0] : memref<16x128xf32, #tpu.memory_space<vmem>>, vector<16x128xf32>
    %cst = arith.constant dense<0.000000e+00> : vector<16xf32>
    %1 = vector.multi_reduction <add>, %0, %cst [1] : vector<16x128xf32> to vector<16xf32>
    %2 = vector.shape_cast %1 : vector<16xf32> to vector<16x1xf32>
    %cst_1 = arith.constant 1.280000e+02 : f32
    %3 = vector.broadcast %cst_1 : f32 to vector<16x1xf32>
    %4 = arith.divf %2, %3 : vector<16x1xf32>
    %5 = vector.broadcast %4 : vector<16x1xf32> to vector<16x128xf32>
    %6 = arith.subf %0, %5 : vector<16x128xf32>
    %7 = arith.mulf %6, %6 : vector<16x128xf32>
    %cst_2 = arith.constant dense<0.000000e+00> : vector<16xf32>
    %8 = vector.multi_reduction <add>, %7, %cst_2 [1] : vector<16x128xf32> to vector<16xf32>
    %9 = vector.shape_cast %8 : vector<16xf32> to vector<16x1xf32>
    %cst_3 = arith.constant 1.270000e+02 : f32
    %10 = vector.broadcast %cst_3 : f32 to vector<16x1xf32>
    %11 = arith.divf %9, %10 : vector<16x1xf32>
    %12 = math.sqrt %11 : vector<16x1xf32>
    %cst_4 = arith.constant 9.99999997E-7 : f32
    %13 = vector.broadcast %cst_4 : f32 to vector<16x1xf32>
    %14 = arith.addf %12, %13 : vector<16x1xf32>
    %15 = tpu.reciprocal %14 {approx = true} : vector<16x1xf32> -> vector<16x1xf32>
    %16 = vector.broadcast %15 : vector<16x1xf32> to vector<16x128xf32>
    %17 = arith.mulf %6, %16 : vector<16x128xf32>
    %18 = arith.truncf %17 : vector<16x128xf32> to vector<16x128xbf16>
    %c0_5 = arith.constant 0 : index
    %c0_6 = arith.constant 0 : index
    %19 = vector.load %arg2[%c0_5, %c0_6] : memref<128x128xbf16, #tpu.memory_space<vmem>>, vector<128x128xbf16>
    %cst_7 = arith.constant dense<0.000000e+00> : vector<16x128xf32>
    %20 = tpu.matmul %18, %19, %cst_7 {dimension_numbers = #tpu.dot_dimension_numbers<[1], [0], [0], [1], [0, 0, 1, 1], [], []>} : vector<16x128xbf16>, vector<128x128xbf16>, vector<16x128xf32> -> vector<16x128xf32>
    %c0_8 = arith.constant 0 : index
    %c0_9 = arith.constant 0 : index
    %21 = vector.load %arg3[%c0_8, %c0_9] : memref<1x128xf32, #tpu.memory_space<vmem>>, vector<1x128xf32>
    %22 = vector.broadcast %21 : vector<1x128xf32> to vector<16x128xf32>
    %23 = arith.addf %20, %22 : vector<16x128xf32>
    %24 = arith.addf %0, %23 : vector<16x128xf32>
    %c0_10 = arith.constant 0 : index
    %c0_11 = arith.constant 0 : index
    %25 = vector.load %arg4[%c0_10, %c0_11] : memref<16x128xf32, #tpu.memory_space<vmem>>, vector<16x128xf32>
    tpu.vector_store %arg4[%c0_10, %c0_11], %24 {strides = array<i32>} : memref<16x128xf32, #tpu.memory_space<vmem>>, vector<16x128xf32>,
    return
  }
  func.func @transform_0(%arg0: i32) -> (i32, i32) {
    %c0_i32 = arith.constant 0 : i32
    %c0_i32_0 = arith.constant 0 : i32
    return %arg0, %c0_i32 : i32, i32
  }
  func.func @transform_1(%arg0: i32) -> (i32, i32) {
    %c0_i32 = arith.constant 0 : i32
    %c0_i32_0 = arith.constant 0 : i32
    %c0_i32_1 = arith.constant 0 : i32
    return %c0_i32, %c0_i32_0 : i32, i32
  }
  func.func @transform_2(%arg0: i32) -> (i32, i32) {
    %c0_i32 = arith.constant 0 : i32
    %c0_i32_0 = arith.constant 0 : i32
    %c0_i32_1 = arith.constant 0 : i32
    return %c0_i32, %c0_i32_0 : i32, i32
  }
  func.func @transform_3(%arg0: i32) -> (i32, i32) {
    %c0_i32 = arith.constant 0 : i32
    %c0_i32_0 = arith.constant 0 : i32
    return %arg0, %c0_i32 : i32, i32
  }
}

</mosaic_0001>

<bundles_post_ra>
// kernel: tpu_custom_call.1
= control target key start
LH: loop header
LB: loop body
LE: loop exit
PB: predicated region body
PF: predicated region fallthrough
CT: control target
= control target key end

     0   :  { %8 = vsyncpa [#allocation3], 0  ;;  %s405_s0 = inlined_call_operand.hbm [shape: f32[16,128], index: 0, kind: input, shape index: {}]   ;;  %s406_s1 = inlined_call_operand.hbm [shape: bf16[128,128], index: 1, kind: input, shape index: {}]   ;;  %s407_s2 = inlined_call_operand.vmem [shape: f32[1,128], index: 2, kind: input, shape index: {}]   ;;  %s408_s3 = inlined_call_operand.hbm [shape: f32[16,128], index: 3, kind: output, shape index: {}]  }
   0x1   :  { %9 = vsyncpa [#allocation6], 0 }
   0x2   :  { %10 = vsyncpa [#allocation4], 0  ;;  %s348_s12 = smov [#allocation2]  }
   0x3   :  { %s16_s13 = sshll.u32 %s348_s12, 4  ;;  %s17_s13 = int_to_ptr.vmem [resolvable:$true] %s16_s13 }
   0x4   :  { %s290_s14 = scalar_lea.vmem %s17_s13, 256  ;;  %p295_p1 = scmp.lt.s32.totalorder %s17_s13, %s17_s13 }
   0x5   :  { %p291_p0 = scmp.ne.s32.totalorder %s17_s13, %s290_s14  ;;  %p296_p2 = scmp.lt.s32.totalorder %s290_s14, %s290_s14 }
   0x7   :  { %p297_p3 = por %p296_p2, %p295_p1 }
   0x9   :  { %p298_p4 = pnand %p297_p3, %p291_p0 }
   0xb   :  { %301 = shalt.err (!%p298_p4)
}
   0xc   :  { %s349_s15 = smov 128   ;;  %s350_s16 = smov 8  }
   0xd   :  { %22 = dma.hbm_to_vmem [thread:$0]  %s405_s0, 256, %s17_s13, [#allocation3], %s349_s15, %s349_s15, %s350_s16  }
   0xe   :  { %s351_s19 = smov [#allocation5]  }
   0xf   :  { %s28_s20 = sshll.u32 %s351_s19, 4  ;;  %s29_s20 = int_to_ptr.vmem [resolvable:$true] %s28_s20 }
  0x10   :  { %s310_s21 = scalar_lea.vmem %s29_s20, 1024  ;;  %p315_p6 = scmp.lt.s32.totalorder %s29_s20, %s29_s20 }
  0x11   :  { %p311_p5 = scmp.ne.s32.totalorder %s29_s20, %s310_s21  ;;  %p316_p7 = scmp.lt.s32.totalorder %s310_s21, %s310_s21 }
  0x13   :  { %p317_p8 = por %p316_p7, %p315_p6 }
  0x15   :  { %p318_p9 = pnand %p317_p8, %p311_p5 }
  0x17   :  { %321 = shalt.err (!%p318_p9)
}
  0x18   :  { %s352_s22 = smov 64   ;;  %s353_s23 = smov 4  }
  0x19   :  { %34 = dma.hbm_to_vmem [thread:$0]  %s406_s1, 1024, %s29_s20, [#allocation6], %s352_s22, %s352_s22, %s353_s23  }
  0x1a   :  { %342 = dma.done.wait [#allocation3], 256  }
  0x1b   :  { %343 = vsyncadd [#allocation3], 4294967040 }
  0x1c   :  { %344 = dma.done.wait [#allocation6], 1024  }
  0x1d   :  { %345 = vsyncadd [#allocation6], 4294966272  ;;  %v386_v0 = vld [vmem:[#allocation2] sm:$0xff]  ;;  %v388_v1 = vld [vmem:[#allocation2 + $0x8] sm:$0xff]  ;;  %v354_v11 = vmov 0.0   ;;  %vm355_vm0 = vmmov 0  }
  0x1e   :  { %46 = vadd.xlane.f32.xlu0 %v386_v0  ;;  %v266_v10 = vld [vmem:[#allocation5 + $0x38] sm:$0xff]   ;;  %237 = vmatprep.subr.bf16.mxu0 %v354_v11  ;;  %v267_v12 = vld [vmem:[#allocation5 + $0x30] sm:$0xff]   ;;  %v268_v13 = vld [vmem:[#allocation5 + $0x28] sm:$0xff]   ;;  %s356_s26 = smov [#allocation7]  }
  0x1f   :  { %238 = vmatpush3.bf16.msra.mxu0 %v266_v10  ;;  %v269_v14 = vld [vmem:[#allocation5 + $0x20] sm:$0xff]   ;;  %v270_v15 = vld [vmem:[#allocation5 + $0x18] sm:$0xff]   ;;  %253 = vmatprep.mubr.msk.bf16.mxu0 %vm355_vm0, %v354_v11  ;;  %v271_v16 = vld [vmem:[#allocation5 + $0x10] sm:$0xff]   ;;  %s206_s27 = sshll.u32 %s356_s26, 4  ;;  %s207_s27 = int_to_ptr.vmem [resolvable:$true] %s206_s27 }
  0x20   :  { %239 = vmatprep.subr.bf16.mxu0 %v354_v11  ;;  %v272_v17 = vld [vmem:[#allocation5 + $0x8] sm:$0xff]   ;;  %v273_v18 = vld [vmem:[#allocation5] sm:$0xff]   ;;  %v219_v40 = vld [vmem:[%s407_s2] ss:$0 sm:$0xff]  ;;  %s322_s28 = scalar_lea.vmem %s207_s27, 256  ;;  %p327_p11 = scmp.lt.s32.totalorder %s207_s27, %s207_s27 }
  0x21   :  { %p323_p10 = scmp.ne.s32.totalorder %s207_s27, %s322_s28  ;;  %p328_p12 = scmp.lt.s32.totalorder %s322_s28, %s322_s28 }
  0x22   :  { %48 = vadd.xlane.f32.xlu0 %v388_v1 }
  0x23   :  { %240 = vmatpush3.bf16.msra.mxu0 %v267_v12  ;;  %p329_p13 = por %p328_p12, %p327_p11 }
  0x24   :  { %241 = vmatprep.subr.bf16.mxu0 %v354_v11 }
  0x25   :  { %p330_p0 = pnand %p329_p13, %p323_p10 }
  0x27   :  { %242 = vmatpush3.bf16.msra.mxu0 %v268_v13 }
  0x28   :  { %243 = vmatprep.subr.bf16.mxu0 %v354_v11 }
  0x2b   :  { %244 = vmatpush3.bf16.msra.mxu0 %v269_v14 }
  0x2c   :  { %245 = vmatprep.subr.bf16.mxu0 %v354_v11 }
  0x2f   :  { %246 = vmatpush3.bf16.msra.mxu0 %v270_v15 }
  0x30   :  { %247 = vmatprep.subr.bf16.mxu0 %v354_v11 }
  0x33   :  { %248 = vmatpush3.bf16.msra.mxu0 %v271_v16 }
  0x34   :  { %249 = vmatprep.subr.bf16.mxu0 %v354_v11 }
  0x37   :  { %250 = vmatpush3.bf16.msra.mxu0 %v272_v17 }
  0x38   :  { %251 = vmatprep.subr.bf16.mxu0 %v354_v11 }
  0x3b   :  { %252 = vmatpush3.bf16.msra.mxu0 %v273_v18 }
  0xa7   :  { %v47_v2 = vpop.xlane.xlu0 %46 }
  0xa8   :  { %v51_v3 = vmul.f32 0.0078125, %v47_v2 }
  0xaa   :  { %v53_v4 = vsub.f32 %v386_v0, %v51_v3 }
  0xab   :  { %v49_v5 = vpop.xlane.xlu0 %48 }
  0xac   :  { %v52_v6 = vmul.f32 0.0078125, %v49_v5  ;;  %v55_v7 = vmul.f32 %v53_v4, %v53_v4 }
  0xae   :  { %v54_v8 = vsub.f32 %v388_v1, %v52_v6  ;;  %57 = vadd.xlane.f32.xlu1 %v55_v7 }
  0xb0   :  { %v56_v9 = vmul.f32 %v54_v8, %v54_v8 }
  0xb2   :  { %59 = vadd.xlane.f32.xlu1 %v56_v9 }
 0x137   :  { %v58_v19 = vpop.xlane.xlu1 %57 }
 0x138   :  { %v62_v20 = vmul.f32 0.007874016, %v58_v19 }
 0x13a   :  { %274 = vrsqrt.f32 %v62_v20  ;;  %vm66_vm1 = vcmp.eq.f32.partialorder %v62_v20, inf  ;;  %v69_v25 = vand.u32 2147483648, %v62_v20  ;;  %vm68_vm2 = vcmp.eq.f32.partialorder %v62_v20, 0.0 }
 0x13b   :  { %v60_v21 = vpop.xlane.xlu1 %59 }
 0x13c   :  { %v63_v22 = vmul.f32 0.007874016, %v60_v21 }
 0x13e   :  { %276 = vrsqrt.f32 %v63_v22  ;;  %vm73_vm3 = vcmp.eq.f32.partialorder %v63_v22, inf  ;;  %v76_v31 = vand.u32 2147483648, %v63_v22  ;;  %vm75_vm4 = vcmp.eq.f32.partialorder %v63_v22, 0.0 }
 0x147   :  { %v275_v23 = vpop.eup %274 }
 0x148   :  { %v65_v24 = vmul.f32 %v275_v23, %v62_v20 }
 0x14a   :  { %v67_v26 = vsel %vm66_vm1, %v62_v20, %v65_v24 }
 0x14b   :  { %v277_v27 = vpop.eup %276  ;;  %v70_v28 = vsel %vm68_vm2, %v69_v25, %v67_v26 }
 0x14c   :  { %v72_v29 = vmul.f32 %v277_v27, %v63_v22  ;;  %v78_v30 = vadd.f32 1e-06, %v70_v28 }
 0x14e   :  { %v74_v32 = vsel %vm73_vm3, %v63_v22, %v72_v29  ;;  %278 = vrcp.f32 %v78_v30 }
 0x14f   :  { %v77_v33 = vsel %vm75_vm4, %v76_v31, %v74_v32 }
 0x150   :  { %v79_v34 = vadd.f32 1e-06, %v77_v33 }
 0x152   :  { %280 = vrcp.f32 %v79_v34 }
 0x15b   :  { %v279_v35 = vpop.eup %278 }
 0x15c   :  { %v82_v37 = vmul.f32 %v279_v35, %v53_v4 }
 0x15f   :  { %v281_v36 = vpop.eup %280 }
 0x160   :  { %v83_v38 = vmul.f32 %v281_v36, %v54_v8 }
 0x162   :  { %v84_v39 = vpack.c.bf16 %v83_v38, %v82_v37 }
 0x164   :  { %254 = vmatmul.mubr.bf16.vlgmr.msra.gmra.mxu0 %v84_v39 }
 0x224   :  { %v190_v41 = vpop.f32.mrf.mxu0 }
 0x225   :  { %v191_v42 = vadd.f32 %v219_v40, %v190_v41 }
 0x226   :  { %v255_v43 = vpop.f32.mrf.mxu0 }
 0x227   :  { %v197_v44 = vadd.f32 %v191_v42, %v386_v0 }
 0x228   :  { %v193_v45 = vpop.f32.mrf.mxu0 }
 0x229   :  { %199 = vst [vmem:[#allocation7] sm:$0xff] %v197_v44  ;;  %v194_v46 = vadd.f32 %v219_v40, %v193_v45 }
 0x22a   :  { %v256_v47 = vpop.f32.mrf.mxu0 }
 0x22b   :  { %v198_v48 = vadd.f32 %v194_v46, %v388_v1 }
 0x22d   :  { %200 = vst [vmem:[#allocation7 + $0x8] sm:$0xff] %v198_v48 }
 0x22e   :  { %333 = shalt.err (!%p330_p0)
}
 0x22f   :  { %212 = dma.vmem_to_hbm [thread:$0]  %s207_s27, 256, %s408_s3, [#allocation4], %s349_s15, %s349_s15, %s350_s16  }
 0x230   :  { %346 = dma.done.wait [#allocation4], 256  }
 0x231   :  { %347 = vsyncadd [#allocation4], 4294967040 }
 0x232   :  { %216 = vsyncpa [#allocation3], 1 }
 0x233   :  { %217 = vsyncpa [#allocation6], 1 }
 0x234   :  { %218 = vsyncpa [#allocation4], 1 }

</bundles_post_ra>
